<compile_context>
chip_gen: v7x
topology: tpu7x:2x2x1
jax: 0.10.0
libtpu: 0.0.40
codegen_flags: <defaults>
</compile_context>

<pallas_src>
import jax
import jax.numpy as jnp
from jax.experimental import pallas as pl
from jax.experimental.pallas import tpu as pltpu


def _normalizer_kernel(g_ref, out_ref):
    # Single-step: global min/max over the whole (B, H) block.
    x = g_ref[...].astype(jnp.float32)                 # [B, H] in VMEM
    mn = jnp.min(x, keepdims=True)                     # [1, 1]  (XLU reduce)
    mx = jnp.max(x, keepdims=True)                     # [1, 1]
    scale = 1.0 / (mx - mn + 1e-9)                     # exact scalar reciprocal
    out_ref[...] = ((x - mn) * scale).astype(out_ref.dtype)   # one VPU pass


def _normalizer_rows_kernel(g_ref, out_ref):
    # Batched: each row is one timestep's flattened (B*H) goal; per-row min/max.
    x = g_ref[...].astype(jnp.float32)                 # [Tb, B*H]
    mn = jnp.min(x, axis=-1, keepdims=True)            # [Tb, 1]
    mx = jnp.max(x, axis=-1, keepdims=True)            # [Tb, 1]
    scale = 1.0 / (mx - mn + 1e-9)                     # per-row exact reciprocal
    out_ref[...] = ((x - mn) * scale).astype(out_ref.dtype)


def hierarchy5_back_forward(goal_norm, goal_up=None, hierarchies_selected=None):
    """Single-step forward of Hierarchy5_back (matches the PyTorch signature)."""
    del goal_up, hierarchies_selected  # never affect the output
    B, H = goal_norm.shape
    nbytes = B * H * goal_norm.dtype.itemsize
    vmem = pl.BlockSpec(memory_space=pltpu.MemorySpace.VMEM)
    return pl.pallas_call(
        _normalizer_kernel,
        out_shape=jax.ShapeDtypeStruct((B, H), goal_norm.dtype),
        in_specs=[vmem],
        out_specs=vmem,
        input_output_aliases={0: 0},
        cost_estimate=pl.CostEstimate(
            flops=3 * B * H, transcendentals=0, bytes_accessed=2 * nbytes),
    )(goal_norm)


def hierarchy5_back_forward_batched(goal_norm_seq,
                                    goal_up_seq=None,
                                    hierarchies_selected_seq=None,
                                    *, steps_per_block=8):
    """T independent forward steps fused into one pallas_call (grid over time)."""
    del goal_up_seq, hierarchies_selected_seq
    T, B, H = goal_norm_seq.shape
    F = B * H
    x = goal_norm_seq.reshape(T, F)                    # lane-denser output slab
    # Tile the time axis; fall back to one full-array block if T doesn't tile.
    tb = steps_per_block if (steps_per_block <= T and T % steps_per_block == 0) else T
    nbytes = T * F * goal_norm_seq.dtype.itemsize
    out = pl.pallas_call(
        _normalizer_rows_kernel,
        out_shape=jax.ShapeDtypeStruct((T, F), goal_norm_seq.dtype),
        grid=(T // tb,),
        in_specs=[pl.BlockSpec((tb, F), lambda i: (i, 0))],
        out_specs=pl.BlockSpec((tb, F), lambda i: (i, 0)),
        input_output_aliases={0: 0},
        cost_estimate=pl.CostEstimate(
            flops=3 * T * F, transcendentals=0, bytes_accessed=2 * nbytes),
        compiler_params=pltpu.CompilerParams(
            dimension_semantics=("parallel",)),       # v7x: shard steps over 2 TCs
    )(x)
    return out.reshape(T, B, H)


def _reference(goal_norm):
    mn = jnp.min(goal_norm)
    mx = jnp.max(goal_norm)
    return (goal_norm - mn) / (mx - mn + 1e-9)


if __name__ == "__main__":
    num_workers = 2          # batch of workers
    hidden_dim = 32          # hidden_dim
    time_horizon = 16        # timesteps fused in the batched path

    key = jax.random.PRNGKey(0)
    k1, k2, k3, k4 = jax.random.split(key, 4)

    goal_norm = jax.random.normal(k1, (num_workers, hidden_dim), dtype=jnp.float32)
    goal_up = jax.random.normal(k2, (num_workers, hidden_dim), dtype=jnp.float32)
    hierarchies_selected = jax.random.normal(k3, (num_workers,), dtype=jnp.float32)

    # Reference first (the kernel aliases its input buffer for the output).
    ref = _reference(goal_norm)

    # Single-step path (mirrors the PyTorch forward exactly).
    goal = jax.block_until_ready(
        hierarchy5_back_forward(goal_norm, goal_up, hierarchies_selected))
    assert goal.shape == (num_workers, hidden_dim)
    assert jnp.allclose(goal, ref, rtol=1e-6, atol=1e-6)
    # Sanity: min-max normalized output spans ~[0, 1].
    assert float(jnp.min(goal)) >= -1e-6 and float(jnp.max(goal)) <= 1.0 + 1e-6

    # Batched path: T independent steps in one pallas_call.
    goal_seq = jax.random.normal(
        k4, (time_horizon, num_workers, hidden_dim), dtype=jnp.float32)
    ref_seq = jax.vmap(_reference)(goal_seq)
    out_seq = jax.block_until_ready(hierarchy5_back_forward_batched(goal_seq))
    assert out_seq.shape == goal_seq.shape
    assert jnp.allclose(out_seq, ref_seq, rtol=1e-6, atol=1e-6)

    print("KERNEL_OK")
</pallas_src>

<mosaic_0001>
module attributes {stable_mosaic.version = 11 : i64} {
  func.func @_normalizer_kernel(%arg0: memref<2x32xf32, #tpu.memory_space<vmem>>, %arg1: memref<2x32xf32, #tpu.memory_space<vmem>>) attributes {dimension_semantics = [], scalar_prefetch = 0 : i64, scratch_operands = 0 : i64, tpu.core_type = #tpu.core_type<tc>} {
    %c0 = arith.constant 0 : index
    %c0_0 = arith.constant 0 : index
    %0 = vector.load %arg0[%c0, %c0_0] : memref<2x32xf32, #tpu.memory_space<vmem>>, vector<2x32xf32>
    %1 = vector.shape_cast %0 : vector<2x32xf32> to vector<1x2x32xf32>
    %cst = arith.constant dense<0x7F800000> : vector<1xf32>
    %2 = vector.multi_reduction <minimumf>, %1, %cst [1, 2] : vector<1x2x32xf32> to vector<1xf32>
    %3 = vector.shape_cast %2 : vector<1xf32> to vector<1x1x1xf32>
    %4 = vector.extract %3[0, 0, 0] : f32 from vector<1x1x1xf32>
    %5 = vector.broadcast %4 : f32 to vector<1x1xf32>
    %6 = vector.shape_cast %0 : vector<2x32xf32> to vector<1x2x32xf32>
    %cst_1 = arith.constant dense<0xFF800000> : vector<1xf32>
    %7 = vector.multi_reduction <maximumf>, %6, %cst_1 [1, 2] : vector<1x2x32xf32> to vector<1xf32>
    %8 = vector.shape_cast %7 : vector<1xf32> to vector<1x1x1xf32>
    %9 = vector.extract %8[0, 0, 0] : f32 from vector<1x1x1xf32>
    %10 = vector.broadcast %9 : f32 to vector<1x1xf32>
    %11 = arith.subf %10, %5 : vector<1x1xf32>
    %cst_2 = arith.constant 9.99999971E-10 : f32
    %12 = vector.broadcast %cst_2 : f32 to vector<1x1xf32>
    %13 = arith.addf %11, %12 : vector<1x1xf32>
    %cst_3 = arith.constant 1.000000e+00 : f32
    %14 = vector.broadcast %cst_3 : f32 to vector<1x1xf32>
    %15 = arith.divf %14, %13 : vector<1x1xf32>
    %16 = vector.broadcast %5 : vector<1x1xf32> to vector<2x32xf32>
    %17 = arith.subf %0, %16 : vector<2x32xf32>
    %18 = vector.broadcast %15 : vector<1x1xf32> to vector<2x32xf32>
    %19 = arith.mulf %17, %18 : vector<2x32xf32>
    %c0_4 = arith.constant 0 : index
    %c0_5 = arith.constant 0 : index
    %20 = vector.load %arg1[%c0_4, %c0_5] : memref<2x32xf32, #tpu.memory_space<vmem>>, vector<2x32xf32>
    tpu.vector_store %arg1[%c0_4, %c0_5], %19 {strides = array<i32>} : memref<2x32xf32, #tpu.memory_space<vmem>>, vector<2x32xf32>,
    return
  }
}

</mosaic_0001>

<bundles_post_ra>
// kernel: tpu_custom_call.1
= control target key start
LH: loop header
LB: loop body
LE: loop exit
PB: predicated region body
PF: predicated region fallthrough
CT: control target
= control target key end

     0   :  { %6 = vsyncpa [#allocation3], 0  ;;  %s162_s0 = inlined_call_operand.hbm [shape: f32[2,32], index: 0, kind: input, shape index: {}, may-alias: {0,1}]   ;;  %s163_s1 = inlined_call_operand.hbm [shape: f32[2,32], index: 1, kind: output, shape index: {}, may-alias: {0,1}]  }
   0x1   :  { %7 = vsyncpa [#allocation4], 0  ;;  %s123_s6 = smov [#allocation2]   ;;  %s75_s10 = scalar_lea.hbm %s162_s0, 32 }
   0x2   :  { %s14_s7 = sshll.u32 %s123_s6, 4  ;;  %p76_p0 = scmp.ne.s32.totalorder %s162_s0, %s75_s10  ;;  %s15_s7 = int_to_ptr.vmem [resolvable:$true] %s14_s7 }
   0x3   :  { %p79_p1 = scmp.lt.u32.totalorder %s75_s10, %s162_s0 }
   0x5   :  { %p81_p2 = pnand %p79_p1, %p76_p0 }
   0x7   :  { %84 = shalt.err (!%p81_p2)
}
   0x8   :  { %s85_s15 = scalar_lea.vmem %s15_s7, 32  ;;  %p90_p4 = scmp.lt.s32.totalorder %s15_s7, %s15_s7 }
   0x9   :  { %p86_p3 = scmp.ne.s32.totalorder %s15_s7, %s85_s15  ;;  %p91_p5 = scmp.lt.s32.totalorder %s85_s15, %s85_s15 }
   0xb   :  { %p92_p6 = por %p91_p5, %p90_p4 }
   0xd   :  { %p93_p7 = pnand %p92_p6, %p86_p3 }
   0xf   :  { %96 = shalt.err (!%p93_p7)
}
  0x10   :  { %17 = dma.hbm_to_vmem [thread:$0]  %s162_s0, 32, %s15_s7, [#allocation3]  }
  0x11   :  { %119 = dma.done.wait [#allocation3], 32  }
  0x12   :  { %120 = vsyncadd [#allocation3], 4294967264  ;;  %vm22_vm0 = vcmask 254976   ;;  %v21_v0 = vld [vmem:[#allocation2] sm:$0x3]  ;;  %s124_s19 = smov [#allocation5]  }
  0x13   :  { %v23_v1 = vsel %vm22_vm0, %v21_v0, inf  ;;  %v34_v2 = vsel %vm22_vm0, %v21_v0, -inf  ;;  %s58_s20 = sshll.u32 %s124_s19, 4  ;;  %s59_s20 = int_to_ptr.vmem [resolvable:$true] %s58_s20 }
  0x14   :  { %24 = vmin.xlane.f32.xlu0 %v23_v1  ;;  %s97_s21 = scalar_lea.vmem %s59_s20, 32  ;;  %p102_p9 = scmp.lt.s32.totalorder %s59_s20, %s59_s20 }
  0x15   :  { %p98_p8 = scmp.ne.s32.totalorder %s59_s20, %s97_s21  ;;  %p103_p10 = scmp.lt.s32.totalorder %s97_s21, %s97_s21 }
  0x17   :  { %p104_p11 = por %p103_p10, %p102_p9 }
  0x18   :  { %35 = vmax.xlane.f32.xlu0 %v34_v2 }
  0x19   :  { %p105_p12 = pnand %p104_p11, %p98_p8 }
  0xa1   :  { %v25_v3 = vpop.xlane.xlu0 %24 }
  0xa2   :  { %v26_v4 = vrot.slane %v25_v3, 4 }
  0xa4   :  { %v27_v5 = vmin.f32 %v25_v3, %v26_v4 }
  0xa5   :  { %v36_v6 = vpop.xlane.xlu0 %35 }
  0xa6   :  { %v28_v7 = vrot.slane %v27_v5, 2  ;;  %v37_v8 = vrot.slane %v36_v6, 4 }
  0xa8   :  { %v38_v9 = vmax.f32 %v36_v6, %v37_v8  ;;  %v29_v10 = vmin.f32 %v27_v5, %v28_v7 }
  0xaa   :  { %v39_v11 = vrot.slane %v38_v9, 2  ;;  %v30_v12 = vrot.slane %v29_v10, 1 }
  0xac   :  { %v40_v13 = vmax.f32 %v38_v9, %v39_v11  ;;  %v31_v14 = vmin.f32 %v29_v10, %v30_v12 }
  0xae   :  { %67 = vpush %v31_v14  ;;  %v41_v15 = vrot.slane %v40_v13, 1 }
  0xb0   :  { %v42_v16 = vmax.f32 %v40_v13, %v41_v15 }
  0xb2   :  { %69 = vpush %v42_v16 }
  0xdf   :  { %s68_s0 = spop %67 }
  0xe0   :  { %v33_v17 = vstv %s68_s0 }
  0xe1   :  { %v49_v21 = vsub.f32 %v21_v0, %v33_v17 }
  0xe3   :  { %s70_s18 = spop %69 }
  0xe4   :  { %v44_v18 = vstv %s70_s18 }
  0xe5   :  { %v45_v19 = vsub.f32 %v44_v18, %v33_v17 }
  0xe7   :  { %v46_v20 = vadd.f32 1e-09, %v45_v19 }
  0xe9   :  { %73 = vrcp.f32 %v46_v20 }
  0xf3   :  { %v74_v22 = vpop.eup %73 }
  0xf4   :  { %v50_v23 = vmul.f32 %v74_v22, %v49_v21 }
  0xf6   :  { %51 = vst.msk [vmem:[#allocation5] sm:$0x3] %vm22_vm0, %v50_v23 }
  0xf7   :  { %108 = shalt.err (!%p105_p12)
}
  0xf8   :  { %s109_s24 = scalar_lea.hbm %s163_s1, 32 }
  0xf9   :  { %p110_p13 = scmp.ne.s32.totalorder %s163_s1, %s109_s24  ;;  %p113_p0 = scmp.lt.u32.totalorder %s109_s24, %s163_s1 }
  0xfb   :  { %p115_p1 = pnand %p113_p0, %p110_p13 }
  0xfd   :  { %118 = shalt.err (!%p115_p1)
}
  0xfe   :  { %61 = dma.vmem_to_hbm [thread:$0]  %s59_s20, 32, %s163_s1, [#allocation4]  }
  0xff   :  { %121 = dma.done.wait [#allocation4], 32  }
 0x100   :  { %122 = vsyncadd [#allocation4], 4294967264 }
 0x101   :  { %65 = vsyncpa [#allocation3], 1 }
 0x102   :  { %66 = vsyncpa [#allocation4], 1 }

</bundles_post_ra>
